<compile_context>
chip_gen: v6e
topology: v6e:2x2x1
jax: 0.10.0
libtpu: 0.0.40
codegen_flags: <defaults>
</compile_context>

<pallas_src>
import jax
import jax.numpy as jnp
from jax import lax
from jax.experimental import pallas as pl
from jax.experimental.pallas import tpu as pltpu

# ---------------- small shapes consistent with the module ----------------
D_EMBD   = 32            # d_embd = k_w * k_h
K_W      = 8
K_H      = 4
NUM_FILT = 8             # conv output channels (module's num_filt)
KH = KW  = 3             # filter_sz = (3, 3)
NUM_ENT  = 50
NUM_REL  = 10
BATCH    = 2

H  = 2 * K_W             # stacked image height (16)
W  = K_H                 # stacked image width  (4)
OH = H - KH + 1          # 14 ('VALID' conv output height)
OW = W - KW + 1          # 2  ('VALID' conv output width)
P  = OH * OW             # 28 spatial positions after conv
TAPS = KH * KW           # 9
FLAT_SZ = NUM_FILT * P   # 224 == flat_sz in the PyTorch module
EPS = 1e-5               # PyTorch BatchNorm eps

ENT_TILE = 512           # lane-dense entity tile (512-wide unmasked stores)


def _round_up(x, m):
    return ((x + m - 1) // m) * m


# ----------------------------- kernels -----------------------------------
def gemm_bias_relu_kernel(x_ref, w_ref, b_ref, o_ref):
    """out = relu(x @ w + b).  Used for both the im2col conv GEMM and the fc GEMM."""
    acc = jnp.dot(x_ref[...], w_ref[...], preferred_element_type=jnp.float32)
    o_ref[...] = jnp.maximum(acc + b_ref[...], 0.0)


def score_kernel(h_ref, ent_ref, ebias_ref, out_ref):
    """score tile = h @ ent_tile.T + bias_tile.

    h_ref     : (B_pad, D)        hidden vectors (grid-invariant)
    ent_ref   : (ENT_TILE, D)     entity-embedding tile, natural layout, bf16 stream
    ebias_ref : (1, ENT_TILE)     entity-bias tile
    out_ref   : (B_pad, ENT_TILE) lane-dense score tile
    """
    scores = lax.dot_general(
        h_ref[...].astype(jnp.bfloat16), ent_ref[...],
        dimension_numbers=(((1,), (1,)), ((), ())),   # contract on D (trans-B)
        preferred_element_type=jnp.float32)
    out_ref[...] = scores + ebias_ref[...]


# ------------------------ one-time precompute -----------------------------
def precompute_conve_params(n_feats, params):
    """Fold eval-mode BatchNorms into the conv/fc weights, permute the fc weight to
    the kernel's position-major conv flatten, and build the lane-padded bf16 entity
    table.  Call ONCE per parameter / entity-embedding update, not per query batch."""
    (wconv, fc_w, fc_b, bias_ent,
     bn0_g, bn0_b, bn0_m, bn0_v,
     bn1_g, bn1_b, bn1_m, bn1_v,
     bn2_g, bn2_b, bn2_m, bn2_v) = params
    f32 = jnp.float32

    bn0_s = bn0_g / jnp.sqrt(bn0_v + EPS); bn0_t = bn0_b - bn0_m * bn0_s   # (1,)
    bn1_s = bn1_g / jnp.sqrt(bn1_v + EPS); bn1_t = bn1_b - bn1_m * bn1_s   # (C,)
    bn2_s = bn2_g / jnp.sqrt(bn2_v + EPS); bn2_t = bn2_b - bn2_m * bn2_s   # (D,)

    # bn0 + bn1 folded into the 3x3 conv (bias=False in the module).
    wc = wconv.reshape(NUM_FILT, TAPS).astype(f32)               # (C, 9), tap = kh*KW+kw
    wconv_fold = (wc * (bn1_s[:, None] * bn0_s[0])).T            # (9, C)
    bconv = (bn1_s * bn0_t[0] * jnp.sum(wc, axis=1) + bn1_t).reshape(1, NUM_FILT)

    # fc weight: column-scale by bn2, then permute rows from PyTorch's channel-major
    # flatten (c*P + p) to the kernel's position-major flatten (p*C + c).
    wfc = (fc_w.T * bn2_s[None, :]).astype(f32)                  # (C*P, D)
    wfc_perm = (wfc.reshape(NUM_FILT, P, D_EMBD)
                   .transpose(1, 0, 2)
                   .reshape(P * NUM_FILT, D_EMBD))               # (P*C, D)
    bfc = (bn2_s * fc_b + bn2_t).reshape(1, D_EMBD).astype(f32)

    # Lane-padded entity table in natural (E, D) layout, streamed as bf16, + bias.
    num_ent = n_feats.shape[0]
    num_ent_pad = _round_up(num_ent, ENT_TILE)
    ent_bf16 = (jnp.zeros((num_ent_pad, D_EMBD), jnp.bfloat16)
                   .at[:num_ent].set(n_feats.astype(jnp.bfloat16)))
    ebias = jnp.zeros((1, num_ent_pad), f32).at[:, :num_ent].set(bias_ent)

    return (wconv_fold, bconv, wfc_perm, bfc, ent_bf16, ebias)


# ------------------------------ forward ----------------------------------
def conve_forward(n_feats, r_feats, sub, rel, pre):
    wconv_fold, bconv, wfc_perm, bfc, ent_bf16, ebias = pre
    f32 = jnp.float32
    B = sub.shape[0]
    B_pad = _round_up(max(B, 8), 8)                  # f32 sublane density
    num_ent = n_feats.shape[0]
    num_ent_pad = ent_bf16.shape[0]

    # --- glue: gather + ConvE.concat() stacking (matches the PyTorch module) ---
    stk = jnp.concatenate([n_feats[sub].reshape(B, 1, D_EMBD),
                           r_feats[rel].reshape(B, 1, D_EMBD)], axis=1)    # (B, 2, D)
    img = jnp.transpose(stk, (0, 2, 1)).reshape(B, H, W).astype(f32)
    img = jnp.zeros((B_pad, H, W), f32).at[:B].set(img)                    # batch pad

    # --- glue: im2col (bn0 is folded into the conv weight) ---
    taps = []
    for kh in range(KH):
        for kw in range(KW):
            taps.append(img[:, kh:kh + OH, kw:kw + OW].reshape(B_pad, P, 1))
    patches = jnp.concatenate(taps, axis=2).reshape(B_pad * P, TAPS)       # (B*P, 9)

    # --- kernel 1: conv as an im2col GEMM (+ folded bn0/bn1, ReLU) ---
    conv_act = pl.pallas_call(
        gemm_bias_relu_kernel,
        out_shape=jax.ShapeDtypeStruct((B_pad * P, NUM_FILT), f32),
    )(patches, wconv_fold, bconv)

    # Free row-major reshape; the channel-major flatten is absorbed in wfc_perm.
    conv_flat = conv_act.reshape(B_pad, P * NUM_FILT)                      # (B, P*C)

    # --- kernel 2: fc (+ folded bn2, ReLU) -> hidden vectors h ---
    h = pl.pallas_call(
        gemm_bias_relu_kernel,
        out_shape=jax.ShapeDtypeStruct((B_pad, D_EMBD), f32),
    )(conv_flat, wfc_perm, bfc)

    # --- kernel 3: entity-score GEMM, tiled over 512-wide entity tiles ---
    n_tiles = num_ent_pad // ENT_TILE
    cost = pl.CostEstimate(
        flops=2 * B_pad * D_EMBD * num_ent_pad,
        transcendentals=0,
        bytes_accessed=(num_ent_pad * D_EMBD * 2        # bf16 entity table
                        + B_pad * D_EMBD * 4            # h
                        + B_pad * num_ent_pad * 4       # scores
                        + num_ent_pad * 4))             # entity bias
    out = pl.pallas_call(
        score_kernel,
        out_shape=jax.ShapeDtypeStruct((B_pad, num_ent_pad), f32),
        grid=(n_tiles,),
        in_specs=[
            pl.BlockSpec((B_pad, D_EMBD), lambda j: (0, 0)),      # h (grid-invariant)
            pl.BlockSpec((ENT_TILE, D_EMBD), lambda j: (j, 0)),   # entity tile (bf16)
            pl.BlockSpec((1, ENT_TILE), lambda j: (0, j)),        # entity-bias tile
        ],
        out_specs=pl.BlockSpec((B_pad, ENT_TILE), lambda j: (0, j)),
        compiler_params=pltpu.CompilerParams(
            dimension_semantics=("parallel",),     # independent tiles -> both TCs on v7x
            vmem_limit_bytes=32 * 1024 * 1024),
        cost_estimate=cost,
    )(h, ent_bf16, ebias)

    return out[:B, :num_ent]


# --------------------------- pure-JAX reference ----------------------------
def conve_reference(n_feats, r_feats, sub, rel, params):
    """Pure-JAX (f32) reference of the same eval-mode forward pass."""
    (wconv, fc_w, fc_b, bias_ent,
     bn0_g, bn0_b, bn0_m, bn0_v,
     bn1_g, bn1_b, bn1_m, bn1_v,
     bn2_g, bn2_b, bn2_m, bn2_v) = params
    B = sub.shape[0]
    stk = jnp.concatenate([n_feats[sub].reshape(B, 1, D_EMBD),
                           r_feats[rel].reshape(B, 1, D_EMBD)], axis=1)
    x = jnp.transpose(stk, (0, 2, 1)).reshape(B, 1, H, W)
    bn0_s = bn0_g / jnp.sqrt(bn0_v + EPS)
    x = x * bn0_s[0] + (bn0_b - bn0_m * bn0_s)[0]
    x = lax.conv_general_dilated(x, wconv, (1, 1), 'VALID',
                                 dimension_numbers=('NCHW', 'OIHW', 'NCHW'))
    bn1_s = bn1_g / jnp.sqrt(bn1_v + EPS)
    x = x * bn1_s.reshape(1, NUM_FILT, 1, 1) \
        + (bn1_b - bn1_m * bn1_s).reshape(1, NUM_FILT, 1, 1)
    x = jnp.maximum(x, 0.0)
    x = x.reshape(B, FLAT_SZ)
    x = x @ fc_w.T + fc_b
    bn2_s = bn2_g / jnp.sqrt(bn2_v + EPS)
    x = x * bn2_s + (bn2_b - bn2_m * bn2_s)
    x = jnp.maximum(x, 0.0)
    return x @ n_feats.T + bias_ent


if __name__ == "__main__":
    key = jax.random.PRNGKey(0)
    ks = jax.random.split(key, 16)

    n_feats = jax.random.normal(ks[0], (NUM_ENT, D_EMBD), jnp.float32) * 0.1
    r_feats = jax.random.normal(ks[1], (NUM_REL, D_EMBD), jnp.float32) * 0.1
    sub = jax.random.randint(ks[2], (BATCH,), 0, NUM_ENT)
    rel = jax.random.randint(ks[3], (BATCH,), 0, NUM_REL)

    wconv    = jax.random.normal(ks[4], (NUM_FILT, 1, KH, KW), jnp.float32) * 0.1
    fc_w     = jax.random.normal(ks[5], (D_EMBD, FLAT_SZ), jnp.float32) * 0.05
    fc_b     = jax.random.normal(ks[6], (D_EMBD,), jnp.float32) * 0.05
    bias_ent = jax.random.normal(ks[7], (NUM_ENT,), jnp.float32) * 0.01

    bn0_g = 1.0 + 0.1 * jax.random.normal(ks[8], (1,), jnp.float32)
    bn0_b = 0.1 * jax.random.normal(ks[9], (1,), jnp.float32)
    bn0_m = 0.05 * jax.random.normal(ks[10], (1,), jnp.float32)
    bn0_v = jnp.ones((1,), jnp.float32)

    bn1_g = 1.0 + 0.1 * jax.random.normal(ks[11], (NUM_FILT,), jnp.float32)
    bn1_b = 0.1 * jax.random.normal(ks[12], (NUM_FILT,), jnp.float32)
    bn1_m = jnp.zeros((NUM_FILT,), jnp.float32)
    bn1_v = jnp.ones((NUM_FILT,), jnp.float32)

    bn2_g = 1.0 + 0.1 * jax.random.normal(ks[13], (D_EMBD,), jnp.float32)
    bn2_b = 0.1 * jax.random.normal(ks[14], (D_EMBD,), jnp.float32)
    bn2_m = jnp.zeros((D_EMBD,), jnp.float32)
    bn2_v = jnp.ones((D_EMBD,), jnp.float32)

    params = (wconv, fc_w, fc_b, bias_ent,
              bn0_g, bn0_b, bn0_m, bn0_v,
              bn1_g, bn1_b, bn1_m, bn1_v,
              bn2_g, bn2_b, bn2_m, bn2_v)

    # Once per parameter / embedding update (hoisted out of the per-query path).
    pre = jax.tree.map(jax.block_until_ready, precompute_conve_params(n_feats, params))

    fwd = jax.jit(conve_forward)
    score = jax.block_until_ready(fwd(n_feats, r_feats, sub, rel, pre))

    ref = conve_reference(n_feats, r_feats, sub, rel, params)
    assert score.shape == (BATCH, NUM_ENT)
    # The f32 path matches at <=2e-3; the extra slack covers the bf16 quantization
    # of the streamed entity table (documented perf trade-off).
    assert jnp.allclose(score, ref, rtol=5e-3, atol=5e-3), \
        f"max abs diff {float(jnp.max(jnp.abs(score - ref)))}"
    print("KERNEL_OK")
</pallas_src>

<mosaic_0001>
module attributes {stable_mosaic.version = 11 : i64} {
  func.func @gemm_bias_relu_kernel(%arg0: memref<224x9xf32, #tpu.memory_space<vmem>>, %arg1: memref<9x8xf32, #tpu.memory_space<vmem>>, %arg2: memref<1x8xf32, #tpu.memory_space<vmem>>, %arg3: memref<224x8xf32, #tpu.memory_space<vmem>>) attributes {dimension_semantics = [], scalar_prefetch = 0 : i64, scratch_operands = 0 : i64, tpu.core_type = #tpu.core_type<tc>} {
    %c0 = arith.constant 0 : index
    %c0_0 = arith.constant 0 : index
    %0 = vector.load %arg0[%c0, %c0_0] : memref<224x9xf32, #tpu.memory_space<vmem>>, vector<224x9xf32>
    %c0_1 = arith.constant 0 : index
    %c0_2 = arith.constant 0 : index
    %1 = vector.load %arg1[%c0_1, %c0_2] : memref<9x8xf32, #tpu.memory_space<vmem>>, vector<9x8xf32>
    %cst = arith.constant dense<0.000000e+00> : vector<224x8xf32>
    %2 = tpu.matmul %0, %1, %cst {dimension_numbers = #tpu.dot_dimension_numbers<[1], [0], [0], [1], [0, 0, 1, 1], [], []>} : vector<224x9xf32>, vector<9x8xf32>, vector<224x8xf32> -> vector<224x8xf32>
    %c0_3 = arith.constant 0 : index
    %c0_4 = arith.constant 0 : index
    %3 = vector.load %arg2[%c0_3, %c0_4] : memref<1x8xf32, #tpu.memory_space<vmem>>, vector<1x8xf32>
    %4 = vector.broadcast %3 : vector<1x8xf32> to vector<224x8xf32>
    %5 = arith.addf %2, %4 : vector<224x8xf32>
    %cst_5 = arith.constant 0.000000e+00 : f32
    %6 = vector.broadcast %cst_5 : f32 to vector<224x8xf32>
    %7 = arith.maximumf %5, %6 : vector<224x8xf32>
    %c0_6 = arith.constant 0 : index
    %c0_7 = arith.constant 0 : index
    %8 = vector.load %arg3[%c0_6, %c0_7] : memref<224x8xf32, #tpu.memory_space<vmem>>, vector<224x8xf32>
    tpu.vector_store %arg3[%c0_6, %c0_7], %7 {strides = array<i32>} : memref<224x8xf32, #tpu.memory_space<vmem>>, vector<224x8xf32>,
    return
  }
}

module attributes {stable_mosaic.version = 11 : i64} {
  func.func @gemm_bias_relu_kernel(%arg0: memref<8x224xf32, #tpu.memory_space<vmem>>, %arg1: memref<224x32xf32, #tpu.memory_space<vmem>>, %arg2: memref<1x32xf32, #tpu.memory_space<vmem>>, %arg3: memref<8x32xf32, #tpu.memory_space<vmem>>) attributes {dimension_semantics = [], scalar_prefetch = 0 : i64, scratch_operands = 0 : i64, tpu.core_type = #tpu.core_type<tc>} {
    %c0 = arith.constant 0 : index
    %c0_0 = arith.constant 0 : index
    %0 = vector.load %arg0[%c0, %c0_0] : memref<8x224xf32, #tpu.memory_space<vmem>>, vector<8x224xf32>
    %c0_1 = arith.constant 0 : index
    %c0_2 = arith.constant 0 : index
    %1 = vector.load %arg1[%c0_1, %c0_2] : memref<224x32xf32, #tpu.memory_space<vmem>>, vector<224x32xf32>
    %cst = arith.constant dense<0.000000e+00> : vector<8x32xf32>
    %2 = tpu.matmul %0, %1, %cst {dimension_numbers = #tpu.dot_dimension_numbers<[1], [0], [0], [1], [0, 0, 1, 1], [], []>} : vector<8x224xf32>, vector<224x32xf32>, vector<8x32xf32> -> vector<8x32xf32>
    %c0_3 = arith.constant 0 : index
    %c0_4 = arith.constant 0 : index
    %3 = vector.load %arg2[%c0_3, %c0_4] : memref<1x32xf32, #tpu.memory_space<vmem>>, vector<1x32xf32>
    %4 = vector.broadcast %3 : vector<1x32xf32> to vector<8x32xf32>
    %5 = arith.addf %2, %4 : vector<8x32xf32>
    %cst_5 = arith.constant 0.000000e+00 : f32
    %6 = vector.broadcast %cst_5 : f32 to vector<8x32xf32>
    %7 = arith.maximumf %5, %6 : vector<8x32xf32>
    %c0_6 = arith.constant 0 : index
    %c0_7 = arith.constant 0 : index
    %8 = vector.load %arg3[%c0_6, %c0_7] : memref<8x32xf32, #tpu.memory_space<vmem>>, vector<8x32xf32>
    tpu.vector_store %arg3[%c0_6, %c0_7], %7 {strides = array<i32>} : memref<8x32xf32, #tpu.memory_space<vmem>>, vector<8x32xf32>,
    return
  }
}

module attributes {stable_mosaic.version = 11 : i64} {
  func.func @score_kernel(%arg0: i32, %arg1: memref<8x32xf32, #tpu.memory_space<vmem>>, %arg2: memref<512x32xbf16, #tpu.memory_space<vmem>>, %arg3: memref<1x512xf32, #tpu.memory_space<vmem>>, %arg4: memref<8x512xf32, #tpu.memory_space<vmem>>) attributes {dimension_semantics = [#tpu.dimension_semantics<parallel>], iteration_bounds = array<i64: 1>, scalar_prefetch = 0 : i64, scratch_operands = 0 : i64, tpu.core_type = #tpu.core_type<tc>, window_params = [{pipeline_mode = #tpu.pipeline_mode<synchronous>, transform_indices = @transform_0, window_bounds = array<i64: 8, 32>}, {transform_indices = @transform_1, window_bounds = array<i64: 512, 32>}, {transform_indices = @transform_2, window_bounds = array<i64: 1, 512>}, {transform_indices = @transform_3, window_bounds = array<i64: 8, 512>}]} {
    %c0 = arith.constant 0 : index
    %c0_0 = arith.constant 0 : index
    %0 = vector.load %arg1[%c0, %c0_0] : memref<8x32xf32, #tpu.memory_space<vmem>>, vector<8x32xf32>
    %1 = arith.truncf %0 : vector<8x32xf32> to vector<8x32xbf16>
    %c0_1 = arith.constant 0 : index
    %c0_2 = arith.constant 0 : index
    %2 = vector.load %arg2[%c0_1, %c0_2] : memref<512x32xbf16, #tpu.memory_space<vmem>>, vector<512x32xbf16>
    %cst = arith.constant dense<0.000000e+00> : vector<8x512xf32>
    %3 = tpu.matmul %1, %2, %cst {dimension_numbers = #tpu.dot_dimension_numbers<[1], [1], [0], [0], [0, 0, 1, 0], [], []>} : vector<8x32xbf16>, vector<512x32xbf16>, vector<8x512xf32> -> vector<8x512xf32>
    %c0_3 = arith.constant 0 : index
    %c0_4 = arith.constant 0 : index
    %4 = vector.load %arg3[%c0_3, %c0_4] : memref<1x512xf32, #tpu.memory_space<vmem>>, vector<1x512xf32>
    %5 = vector.broadcast %4 : vector<1x512xf32> to vector<8x512xf32>
    %6 = arith.addf %3, %5 : vector<8x512xf32>
    %c0_5 = arith.constant 0 : index
    %c0_6 = arith.constant 0 : index
    %7 = vector.load %arg4[%c0_5, %c0_6] : memref<8x512xf32, #tpu.memory_space<vmem>>, vector<8x512xf32>
    tpu.vector_store %arg4[%c0_5, %c0_6], %6 {strides = array<i32>} : memref<8x512xf32, #tpu.memory_space<vmem>>, vector<8x512xf32>,
    return
  }
  func.func @transform_0(%arg0: i32) -> (i32, i32) {
    %c0_i32 = arith.constant 0 : i32
    %c0_i32_0 = arith.constant 0 : i32
    %c0_i32_1 = arith.constant 0 : i32
    return %c0_i32, %c0_i32_0 : i32, i32
  }
  func.func @transform_1(%arg0: i32) -> (i32, i32) {
    %c0_i32 = arith.constant 0 : i32
    %c0_i32_0 = arith.constant 0 : i32
    return %arg0, %c0_i32 : i32, i32
  }
  func.func @transform_2(%arg0: i32) -> (i32, i32) {
    %c0_i32 = arith.constant 0 : i32
    %c0_i32_0 = arith.constant 0 : i32
    return %c0_i32, %arg0 : i32, i32
  }
  func.func @transform_3(%arg0: i32) -> (i32, i32) {
    %c0_i32 = arith.constant 0 : i32
    %c0_i32_0 = arith.constant 0 : i32
    return %c0_i32, %arg0 : i32, i32
  }
}

</mosaic_0001>

<bundles_post_ra>
// kernel: conve_forward.4
= control target key start
LH: loop header
LB: loop body
LE: loop exit
PB: predicated region body
PF: predicated region fallthrough
CT: control target
= control target key end

     0   :  { %v135_v0 = vmov 0.0   ;;  %vm51_vm0 = vcmask 785408   ;;  %vm126_vm1 = vcmask 261120   ;;  %s280_s1 = inlined_call_operand.vmem [shape: f32[224,32], index: 1, kind: input, shape index: {}]   ;;  %s281_s0 = inlined_call_operand.vmem [shape: f32[8,224], index: 0, kind: input, shape index: {}]   ;;  %s282_s2 = inlined_call_operand.vmem [shape: f32[1,32], index: 2, kind: input, shape index: {}]   ;;  %s283_s3 = inlined_call_operand.vmem [shape: f32[8,32], index: 3, kind: output, shape index: {}]  }
   0x1   :  { %55 = vmatprep.subr.mxu0 %v135_v0  ;;  %v31_v1 = vld [vmem:[%s280_s1 + $0x78] sm:$0xff]  ;;  %v30_v2 = vld [vmem:[%s280_s1 + $0x70] sm:$0xff]  ;;  %v29_v3 = vld [vmem:[%s280_s1 + $0x68] sm:$0xff] }
   0x2   :  { %56 = vmatpush1.msra.mxu0 %v31_v1  ;;  %v28_v4 = vld [vmem:[%s280_s1 + $0x60] sm:$0xff]  ;;  %v27_v5 = vld [vmem:[%s280_s1 + $0x58] sm:$0xff]  ;;  %v26_v6 = vld [vmem:[%s280_s1 + $0x50] sm:$0xff] }
   0x3   :  { %57 = vmatprep.subr.mxu0 %v135_v0  ;;  %v15_v7 = vld [vmem:[%s281_s0 + $0x8] sm:$0xff]  ;;  %v24_v9 = vld [vmem:[%s280_s1 + $0x40] sm:$0xff]  ;;  %v23_v10 = vld [vmem:[%s280_s1 + $0x38] sm:$0xff] }
   0x4   :  { %58 = vmatpush1.msra.mxu0 %v30_v2  ;;  %v25_v8 = vld [vmem:[%s280_s1 + $0x48] sm:$0xff]  ;;  %133 = vmatprep.mubr.msk.f32.mxu0 %vm51_vm0, %v15_v7  ;;  %v22_v11 = vld [vmem:[%s280_s1 + $0x30] sm:$0xff]  ;;  %v20_v13 = vld [vmem:[%s280_s1 + $0x20] sm:$0xff] }
   0x5   :  { %59 = vmatprep.subr.mxu0 %v135_v0  ;;  %v21_v12 = vld [vmem:[%s280_s1 + $0x28] sm:$0xff]  ;;  %v19_v14 = vld [vmem:[%s280_s1 + $0x18] sm:$0xff]  ;;  %v18_v15 = vld [vmem:[%s280_s1 + $0x10] sm:$0xff] }
   0x6   :  { %60 = vmatpush1.msra.mxu0 %v29_v3  ;;  %v17_v16 = vld [vmem:[%s280_s1 + $0x8] sm:$0xff]  ;;  %v16_v17 = vld [vmem:[%s280_s1] sm:$0xff]  ;;  %v43_v18 = vld [vmem:[%s280_s1 + $0xd8] sm:$0xff] }
   0x7   :  { %61 = vmatprep.subr.mxu0 %v135_v0  ;;  %v42_v19 = vld [vmem:[%s280_s1 + $0xd0] sm:$0xff]  ;;  %v41_v20 = vld [vmem:[%s280_s1 + $0xc8] sm:$0xff]  ;;  %v40_v21 = vld [vmem:[%s280_s1 + $0xc0] sm:$0xff] }
   0x8   :  { %62 = vmatpush1.msra.mxu0 %v28_v4  ;;  %v39_v22 = vld [vmem:[%s280_s1 + $0xb8] sm:$0xff]  ;;  %v38_v23 = vld [vmem:[%s280_s1 + $0xb0] sm:$0xff]  ;;  %v37_v24 = vld [vmem:[%s280_s1 + $0xa8] sm:$0xff] }
   0x9   :  { %63 = vmatprep.subr.mxu0 %v135_v0  ;;  %v36_v25 = vld [vmem:[%s280_s1 + $0xa0] sm:$0xff]  ;;  %v35_v26 = vld [vmem:[%s280_s1 + $0x98] sm:$0xff]  ;;  %v34_v27 = vld [vmem:[%s280_s1 + $0x90] sm:$0xff] }
   0xa   :  { %64 = vmatpush1.msra.mxu0 %v27_v5  ;;  %v33_v28 = vld [vmem:[%s280_s1 + $0x88] sm:$0xff]  ;;  %v32_v29 = vld [vmem:[%s280_s1 + $0x80] sm:$0xff] }
   0xb   :  { %65 = vmatprep.subr.mxu0 %v135_v0  ;;  %v14_v30 = vld [vmem:[%s281_s0] sm:$0xff] }
   0xc   :  { %66 = vmatpush1.msra.mxu0 %v26_v6  ;;  %v132_v31 = vld [vmem:[%s282_s2] ss:$0 sm:$0xff] }
   0xd   :  { %67 = vmatprep.subr.mxu0 %v135_v0 }
   0xe   :  { %68 = vmatpush1.msra.mxu0 %v25_v8 }
   0xf   :  { %69 = vmatprep.subr.mxu0 %v135_v0 }
  0x10   :  { %70 = vmatpush1.msra.mxu0 %v24_v9 }
  0x11   :  { %71 = vmatprep.subr.mxu0 %v135_v0 }
  0x12   :  { %72 = vmatpush1.msra.mxu0 %v23_v10 }
  0x13   :  { %73 = vmatprep.subr.mxu0 %v135_v0 }
  0x14   :  { %74 = vmatpush1.msra.mxu0 %v22_v11 }
  0x15   :  { %75 = vmatprep.subr.mxu0 %v135_v0 }
  0x16   :  { %76 = vmatpush1.msra.mxu0 %v21_v12 }
  0x17   :  { %77 = vmatprep.subr.mxu0 %v135_v0 }
  0x18   :  { %78 = vmatpush1.msra.mxu0 %v20_v13 }
  0x19   :  { %79 = vmatprep.subr.mxu0 %v135_v0 }
  0x1a   :  { %80 = vmatpush1.msra.mxu0 %v19_v14 }
  0x1b   :  { %81 = vmatprep.subr.mxu0 %v135_v0 }
  0x1c   :  { %82 = vmatpush1.msra.mxu0 %v18_v15 }
  0x1d   :  { %83 = vmatprep.subr.mxu0 %v135_v0 }
  0x1e   :  { %84 = vmatpush1.msra.mxu0 %v17_v16 }
  0x1f   :  { %85 = vmatprep.subr.mxu0 %v135_v0 }
  0x20   :  { %86 = vmatpush1.msra.mxu0 %v16_v17 }
  0x21   :  { %95 = vmatprep.subr.mxu0 %v135_v0 }
  0x22   :  { %96 = vmatpush2.msra.mxu0 %v43_v18 }
  0x23   :  { %97 = vmatprep.subr.mxu0 %v135_v0 }
  0x24   :  { %98 = vmatpush2.msra.mxu0 %v42_v19 }
  0x25   :  { %99 = vmatprep.subr.mxu0 %v135_v0 }
  0x26   :  { %100 = vmatpush2.msra.mxu0 %v41_v20 }
  0x27   :  { %101 = vmatprep.subr.mxu0 %v135_v0 }
  0x28   :  { %102 = vmatpush2.msra.mxu0 %v40_v21 }
  0x29   :  { %103 = vmatprep.subr.mxu0 %v135_v0 }
  0x2a   :  { %104 = vmatpush2.msra.mxu0 %v39_v22 }
  0x2b   :  { %105 = vmatprep.subr.mxu0 %v135_v0 }
  0x2c   :  { %106 = vmatpush2.msra.mxu0 %v38_v23 }
  0x2d   :  { %107 = vmatprep.subr.mxu0 %v135_v0 }
  0x2e   :  { %108 = vmatpush2.msra.mxu0 %v37_v24 }
  0x2f   :  { %109 = vmatprep.subr.mxu0 %v135_v0 }
  0x30   :  { %110 = vmatpush2.msra.mxu0 %v36_v25 }
  0x31   :  { %111 = vmatprep.subr.mxu0 %v135_v0 }
  0x32   :  { %112 = vmatpush2.msra.mxu0 %v35_v26 }
  0x33   :  { %113 = vmatprep.subr.mxu0 %v135_v0 }
  0x34   :  { %114 = vmatpush2.msra.mxu0 %v34_v27 }
  0x35   :  { %115 = vmatprep.subr.mxu0 %v135_v0 }
  0x36   :  { %116 = vmatpush2.msra.mxu0 %v33_v28 }
  0x37   :  { %117 = vmatprep.subr.mxu0 %v135_v0 }
  0x38   :  { %118 = vmatpush2.msra.mxu0 %v32_v29 }
  0x39   :  { %120 = vmatmul.mubr.f32.vlgmr.msra.gmra.mxu0 %v14_v30 }
  0xf9   :  { %v121_v32 = vpop.f32.mrf.mxu0 }
  0xfa   :  { %v122_v33 = vadd.f32 %v132_v31, %v121_v32 }
  0xfb   :  { %v123_v34 = vpop.f32.mrf.mxu0 }
  0xfc   :  { %v125_v35 = vmax.f32 %v122_v33, 0.0 }
  0xfe   :  { %127 = vst.msk [vmem:[%s283_s3] sm:$0xff] %vm126_vm1, %v125_v35 }

// kernel: conve_forward.3
= control target key start
LH: loop header
LB: loop body
LE: loop exit
PB: predicated region body
PF: predicated region fallthrough
CT: control target
= control target key end

     0   :  { %vm136_vm0 = vcmask 1040384   ;;  %vm51_vm1 = vcmask 72704   ;;  %vm373_vm2 = vcmask 64512   ;;  %s799_s1 = inlined_call_operand.vmem [shape: f32[9,8], index: 1, kind: input, shape index: {}]   ;;  %s800_s0 = inlined_call_operand.vmem [shape: f32[224,9], index: 0, kind: input, shape index: {}]   ;;  %s801_s2 = inlined_call_operand.vmem [shape: f32[1,8], index: 2, kind: input, shape index: {}]   ;;  %s802_s3 = inlined_call_operand.vmem [shape: f32[224,8], index: 3, kind: output, shape index: {}]  }
   0x1   :  { %v43_v0 = vld [vmem:[%s799_s1 + $0x8] sm:$0x1]  ;;  %v42_v1 = vld [vmem:[%s799_s1] sm:$0xff]  ;;  %v28_v3 = vld [vmem:[%s800_s0 + $0x70] sm:$0xff] }
   0x2   :  { %466 = vmatprep.subr.msk.mxu0 %vm136_vm0, %v43_v0  ;;  %512 = vmatprep.subr.msk.mxu1 %vm136_vm0, %v43_v0  ;;  %v14_v2 = vld [vmem:[%s800_s0] sm:$0xff]  ;;  %v15_v4 = vld [vmem:[%s800_s0 + $0x8] sm:$0xff]  ;;  %v29_v5 = vld [vmem:[%s800_s0 + $0x78] sm:$0xff] }
   0x3   :  { %467 = vmatpush3.msk.msra.mxu0 %vm136_vm0, %v43_v0  ;;  %514 = vmatpush3.msk.msra.mxu1 %vm136_vm0, %v43_v0  ;;  %v16_v6 = vld [vmem:[%s800_s0 + $0x10] sm:$0xff]  ;;  %v30_v7 = vld [vmem:[%s800_s0 + $0x80] sm:$0xff]  ;;  %v17_v8 = vld [vmem:[%s800_s0 + $0x18] sm:$0xff] }
   0x4   :  { %468 = vmatprep.subr.mxu0 %v42_v1  ;;  %513 = vmatprep.subr.mxu1 %v42_v1  ;;  %v31_v9 = vld [vmem:[%s800_s0 + $0x88] sm:$0xff]  ;;  %v18_v10 = vld [vmem:[%s800_s0 + $0x20] sm:$0xff]  ;;  %v32_v11 = vld [vmem:[%s800_s0 + $0x90] sm:$0xff] }
   0x5   :  { %469 = vmatpush3.msra.mxu0 %v42_v1  ;;  %515 = vmatpush3.msra.mxu1 %v42_v1  ;;  %v19_v12 = vld [vmem:[%s800_s0 + $0x28] sm:$0xff]  ;;  %v33_v13 = vld [vmem:[%s800_s0 + $0x98] sm:$0xff]  ;;  %v20_v14 = vld [vmem:[%s800_s0 + $0x30] sm:$0xff] }
   0x6   :  { %470 = vmatprep.mubr.msk.f32.mxu0 %vm51_vm1, %v14_v2  ;;  %491 = vmatprep.mubr.msk.f32.mxu1 %vm51_vm1, %v28_v3  ;;  %v34_v15 = vld [vmem:[%s800_s0 + $0xa0] sm:$0xff]  ;;  %v21_v16 = vld [vmem:[%s800_s0 + $0x38] sm:$0xff]  ;;  %v35_v17 = vld [vmem:[%s800_s0 + $0xa8] sm:$0xff] }
   0x7   :  { %471 = vmatmul.mubr.msk.f32.vlgmr.msra.gmra.mxu0 %vm51_vm1, %v15_v4  ;;  %492 = vmatmul.mubr.msk.f32.vlgmr.msra.gmra.mxu1 %vm51_vm1, %v29_v5  ;;  %v22_v18 = vld [vmem:[%s800_s0 + $0x40] sm:$0xff]  ;;  %v36_v19 = vld [vmem:[%s800_s0 + $0xb0] sm:$0xff]  ;;  %v23_v20 = vld [vmem:[%s800_s0 + $0x48] sm:$0xff] }
   0x8   :  { %473 = vmatprep.mubr.msk.f32.mxu0 %vm51_vm1, %v16_v6  ;;  %494 = vmatprep.mubr.msk.f32.mxu1 %vm51_vm1, %v30_v7  ;;  %v37_v21 = vld [vmem:[%s800_s0 + $0xb8] sm:$0xff]  ;;  %v24_v22 = vld [vmem:[%s800_s0 + $0x50] sm:$0xff]  ;;  %v38_v23 = vld [vmem:[%s800_s0 + $0xc0] sm:$0xff] }
   0x9   :  { %v25_v24 = vld [vmem:[%s800_s0 + $0x58] sm:$0xff]  ;;  %v39_v25 = vld [vmem:[%s800_s0 + $0xc8] sm:$0xff]  ;;  %v26_v26 = vld [vmem:[%s800_s0 + $0x60] sm:$0xff] }
   0xa   :  { %v40_v27 = vld [vmem:[%s800_s0 + $0xd0] sm:$0xff]  ;;  %v27_v28 = vld [vmem:[%s800_s0 + $0x68] sm:$0xff]  ;;  %v41_v29 = vld [vmem:[%s800_s0 + $0xd8] sm:$0xff] }
   0xb   :  { %474 = vmatmul.mubr.msk.f32.gmra.mxu0 %vm51_vm1, %v17_v8  ;;  %495 = vmatmul.mubr.msk.f32.gmra.mxu1 %vm51_vm1, %v31_v9  ;;  %v657_v30 = vld [vmem:[%s801_s2] ss:$0 sm:$0xff] }
   0xc   :  { %476 = vmatprep.mubr.msk.f32.mxu0 %vm51_vm1, %v18_v10  ;;  %497 = vmatprep.mubr.msk.f32.mxu1 %vm51_vm1, %v32_v11 }
   0xf   :  { %477 = vmatmul.mubr.msk.f32.gmra.mxu0 %vm51_vm1, %v19_v12  ;;  %498 = vmatmul.mubr.msk.f32.gmra.mxu1 %vm51_vm1, %v33_v13 }
  0x10   :  { %479 = vmatprep.mubr.msk.f32.mxu0 %vm51_vm1, %v20_v14  ;;  %500 = vmatprep.mubr.msk.f32.mxu1 %vm51_vm1, %v34_v15 }
  0x13   :  { %480 = vmatmul.mubr.msk.f32.gmra.mxu0 %vm51_vm1, %v21_v16  ;;  %501 = vmatmul.mubr.msk.f32.gmra.mxu1 %vm51_vm1, %v35_v17 }
  0x14   :  { %482 = vmatprep.mubr.msk.f32.mxu0 %vm51_vm1, %v22_v18  ;;  %503 = vmatprep.mubr.msk.f32.mxu1 %vm51_vm1, %v36_v19 }
  0x17   :  { %483 = vmatmul.mubr.msk.f32.gmra.mxu0 %vm51_vm1, %v23_v20  ;;  %504 = vmatmul.mubr.msk.f32.gmra.mxu1 %vm51_vm1, %v37_v21 }
  0x18   :  { %485 = vmatprep.mubr.msk.f32.mxu0 %vm51_vm1, %v24_v22  ;;  %506 = vmatprep.mubr.msk.f32.mxu1 %vm51_vm1, %v38_v23 }
  0x1b   :  { %486 = vmatmul.mubr.msk.f32.gmra.mxu0 %vm51_vm1, %v25_v24  ;;  %507 = vmatmul.mubr.msk.f32.gmra.mxu1 %vm51_vm1, %v39_v25 }
  0x1c   :  { %488 = vmatprep.mubr.msk.f32.mxu0 %vm51_vm1, %v26_v26  ;;  %509 = vmatprep.mubr.msk.f32.mxu1 %vm51_vm1, %v40_v27 }
  0x1f   :  { %489 = vmatmul.mubr.msk.f32.gmra.mxu0 %vm51_vm1, %v27_v28  ;;  %510 = vmatmul.mubr.msk.f32.gmra.mxu1 %vm51_vm1, %v41_v29 }
  0xc7   :  { %v472_v31 = vpop.f32.mrf.mxu0  ;;  %v493_v32 = vpop.f32.mrf.mxu1 }
  0xc8   :  { %v212_v33 = vadd.f32 %v472_v31, %v657_v30  ;;  %v282_v34 = vadd.f32 %v493_v32, %v657_v30 }
  0xc9   :  { %v206_v35 = vpop.f32.mrf.mxu0  ;;  %v276_v36 = vpop.f32.mrf.mxu1 }
  0xca   :  { %v346_v37 = vmax.f32 %v212_v33, 0.0  ;;  %v360_v38 = vmax.f32 %v282_v34, 0.0  ;;  %v207_v39 = vadd.f32 %v657_v30, %v206_v35  ;;  %v277_v40 = vadd.f32 %v657_v30, %v276_v36 }
  0xcb   :  { %v475_v41 = vpop.f32.mrf.mxu0  ;;  %v496_v42 = vpop.f32.mrf.mxu1 }
  0xcc   :  { %375 = vst.msk [vmem:[%s802_s3 + $0x8] sm:$0xff] %vm373_vm2, %v346_v37  ;;  %389 = vst.msk [vmem:[%s802_s3 + $0x78] sm:$0xff] %vm373_vm2, %v360_v38  ;;  %v345_v43 = vmax.f32 %v207_v39, 0.0  ;;  %v359_v44 = vmax.f32 %v277_v40, 0.0  ;;  %v222_v45 = vadd.f32 %v475_v41, %v657_v30  ;;  %v292_v46 = vadd.f32 %v496_v42, %v657_v30 }
  0xcd   :  { %v216_v47 = vpop.f32.mrf.mxu0  ;;  %v286_v48 = vpop.f32.mrf.mxu1 }
  0xce   :  { %374 = vst.msk [vmem:[%s802_s3] sm:$0xff] %vm373_vm2, %v345_v43  ;;  %388 = vst.msk [vmem:[%s802_s3 + $0x70] sm:$0xff] %vm373_vm2, %v359_v44  ;;  %v348_v49 = vmax.f32 %v222_v45, 0.0  ;;  %v362_v50 = vmax.f32 %v292_v46, 0.0  ;;  %v217_v51 = vadd.f32 %v657_v30, %v216_v47  ;;  %v287_v52 = vadd.f32 %v657_v30, %v286_v48 }
  0xcf   :  { %v478_v53 = vpop.f32.mrf.mxu0  ;;  %v499_v54 = vpop.f32.mrf.mxu1 }
  0xd0   :  { %377 = vst.msk [vmem:[%s802_s3 + $0x18] sm:$0xff] %vm373_vm2, %v348_v49  ;;  %391 = vst.msk [vmem:[%s802_s3 + $0x88] sm:$0xff] %vm373_vm2, %v362_v50  ;;  %v347_v55 = vmax.f32 %v217_v51, 0.0  ;;  %v361_v56 = vmax.f32 %v287_v52, 0.0  ;;  %v232_v57 = vadd.f32 %v478_v53, %v657_v30  ;;  %v302_v58 = vadd.f32 %v499_v54, %v657_v30 }
  0xd1   :  { %v226_v59 = vpop.f32.mrf.mxu0  ;;  %v296_v60 = vpop.f32.mrf.mxu1 }
  0xd2   :  { %376 = vst.msk [vmem:[%s802_s3 + $0x10] sm:$0xff] %vm373_vm2, %v347_v55  ;;  %390 = vst.msk [vmem:[%s802_s3 + $0x80] sm:$0xff] %vm373_vm2, %v361_v56  ;;  %v350_v61 = vmax.f32 %v232_v57, 0.0  ;;  %v364_v62 = vmax.f32 %v302_v58, 0.0  ;;  %v227_v63 = vadd.f32 %v657_v30, %v226_v59  ;;  %v297_v0 = vadd.f32 %v657_v30, %v296_v60 }
  0xd3   :  { %v481_v1 = vpop.f32.mrf.mxu0  ;;  %v502_v2 = vpop.f32.mrf.mxu1 }
  0xd4   :  { %379 = vst.msk [vmem:[%s802_s3 + $0x28] sm:$0xff] %vm373_vm2, %v350_v61  ;;  %393 = vst.msk [vmem:[%s802_s3 + $0x98] sm:$0xff] %vm373_vm2, %v364_v62  ;;  %v349_v3 = vmax.f32 %v227_v63, 0.0  ;;  %v363_v4 = vmax.f32 %v297_v0, 0.0  ;;  %v242_v5 = vadd.f32 %v481_v1, %v657_v30  ;;  %v312_v6 = vadd.f32 %v502_v2, %v657_v30 }
  0xd5   :  { %v236_v7 = vpop.f32.mrf.mxu0  ;;  %v306_v8 = vpop.f32.mrf.mxu1 }
  0xd6   :  { %378 = vst.msk [vmem:[%s802_s3 + $0x20] sm:$0xff] %vm373_vm2, %v349_v3  ;;  %392 = vst.msk [vmem:[%s802_s3 + $0x90] sm:$0xff] %vm373_vm2, %v363_v4  ;;  %v352_v9 = vmax.f32 %v242_v5, 0.0  ;;  %v366_v10 = vmax.f32 %v312_v6, 0.0  ;;  %v237_v11 = vadd.f32 %v657_v30, %v236_v7  ;;  %v307_v12 = vadd.f32 %v657_v30, %v306_v8 }
  0xd7   :  { %v484_v13 = vpop.f32.mrf.mxu0  ;;  %v505_v14 = vpop.f32.mrf.mxu1 }
  0xd8   :  { %381 = vst.msk [vmem:[%s802_s3 + $0x38] sm:$0xff] %vm373_vm2, %v352_v9  ;;  %395 = vst.msk [vmem:[%s802_s3 + $0xa8] sm:$0xff] %vm373_vm2, %v366_v10  ;;  %v351_v15 = vmax.f32 %v237_v11, 0.0  ;;  %v365_v16 = vmax.f32 %v307_v12, 0.0  ;;  %v252_v17 = vadd.f32 %v484_v13, %v657_v30  ;;  %v322_v18 = vadd.f32 %v505_v14, %v657_v30 }
  0xd9   :  { %v246_v19 = vpop.f32.mrf.mxu0  ;;  %v316_v20 = vpop.f32.mrf.mxu1 }
  0xda   :  { %380 = vst.msk [vmem:[%s802_s3 + $0x30] sm:$0xff] %vm373_vm2, %v351_v15  ;;  %394 = vst.msk [vmem:[%s802_s3 + $0xa0] sm:$0xff] %vm373_vm2, %v365_v16  ;;  %v354_v21 = vmax.f32 %v252_v17, 0.0  ;;  %v368_v22 = vmax.f32 %v322_v18, 0.0  ;;  %v247_v23 = vadd.f32 %v657_v30, %v246_v19  ;;  %v317_v24 = vadd.f32 %v657_v30, %v316_v20 }
  0xdb   :  { %v487_v25 = vpop.f32.mrf.mxu0  ;;  %v508_v26 = vpop.f32.mrf.mxu1 }
  0xdc   :  { %383 = vst.msk [vmem:[%s802_s3 + $0x48] sm:$0xff] %vm373_vm2, %v354_v21  ;;  %397 = vst.msk [vmem:[%s802_s3 + $0xb8] sm:$0xff] %vm373_vm2, %v368_v22  ;;  %v353_v27 = vmax.f32 %v247_v23, 0.0  ;;  %v367_v28 = vmax.f32 %v317_v24, 0.0  ;;  %v262_v29 = vadd.f32 %v487_v25, %v657_v30  ;;  %v332_v31 = vadd.f32 %v508_v26, %v657_v30 }
  0xdd   :  { %v256_v32 = vpop.f32.mrf.mxu0  ;;  %v326_v33 = vpop.f32.mrf.mxu1 }
  0xde   :  { %382 = vst.msk [vmem:[%s802_s3 + $0x40] sm:$0xff] %vm373_vm2, %v353_v27  ;;  %396 = vst.msk [vmem:[%s802_s3 + $0xb0] sm:$0xff] %vm373_vm2, %v367_v28  ;;  %v356_v34 = vmax.f32 %v262_v29, 0.0  ;;  %v370_v35 = vmax.f32 %v332_v31, 0.0  ;;  %v257_v36 = vadd.f32 %v657_v30, %v256_v32  ;;  %v327_v37 = vadd.f32 %v657_v30, %v326_v33 }
  0xdf   :  { %v490_v38 = vpop.f32.mrf.mxu0  ;;  %v511_v39 = vpop.f32.mrf.mxu1 }
  0xe0   :  { %385 = vst.msk [vmem:[%s802_s3 + $0x58] sm:$0xff] %vm373_vm2, %v356_v34  ;;  %399 = vst.msk [vmem:[%s802_s3 + $0xc8] sm:$0xff] %vm373_vm2, %v370_v35  ;;  %v355_v40 = vmax.f32 %v257_v36, 0.0  ;;  %v369_v41 = vmax.f32 %v327_v37, 0.0  ;;  %v272_v42 = vadd.f32 %v490_v38, %v657_v30  ;;  %v342_v43 = vadd.f32 %v511_v39, %v657_v30 }
  0xe1   :  { %v266_v44 = vpop.f32.mrf.mxu0  ;;  %v336_v45 = vpop.f32.mrf.mxu1 }
  0xe2   :  { %384 = vst.msk [vmem:[%s802_s3 + $0x50] sm:$0xff] %vm373_vm2, %v355_v40  ;;  %398 = vst.msk [vmem:[%s802_s3 + $0xc0] sm:$0xff] %vm373_vm2, %v369_v41  ;;  %v358_v46 = vmax.f32 %v272_v42, 0.0  ;;  %v372_v47 = vmax.f32 %v342_v43, 0.0  ;;  %v267_v48 = vadd.f32 %v657_v30, %v266_v44  ;;  %v337_v49 = vadd.f32 %v657_v30, %v336_v45 }
  0xe4   :  { %387 = vst.msk [vmem:[%s802_s3 + $0x68] sm:$0xff] %vm373_vm2, %v358_v46  ;;  %401 = vst.msk [vmem:[%s802_s3 + $0xd8] sm:$0xff] %vm373_vm2, %v372_v47  ;;  %v357_v50 = vmax.f32 %v267_v48, 0.0  ;;  %v371_v51 = vmax.f32 %v337_v49, 0.0 }
  0xe6   :  { %386 = vst.msk [vmem:[%s802_s3 + $0x60] sm:$0xff] %vm373_vm2, %v357_v50  ;;  %400 = vst.msk [vmem:[%s802_s3 + $0xd0] sm:$0xff] %vm373_vm2, %v371_v51 }

// kernel: conve_forward.5
= control target key start
LH: loop header
LB: loop body
LE: loop exit
PB: predicated region body
PF: predicated region fallthrough
CT: control target
= control target key end

     0   :  { %vm263_vm0 = vcmask 261120   ;;  %v83_v50 = vlaneseq  ;;  %s741_s1 = inlined_call_operand.vmem [shape: bf16[512,32], index: 1, kind: input, shape index: {}]   ;;  %s742_s0 = inlined_call_operand.vmem [shape: f32[8,32], index: 0, kind: input, shape index: {}]   ;;  %s743_s2 = inlined_call_operand.vmem [shape: f32[1,512], index: 2, kind: input, shape index: {}]   ;;  %s744_s3 = inlined_call_operand.vmem [shape: f32[8,512], index: 3, kind: output, shape index: {}]  }
   0x1   :  { %v539_v0 = vld [vmem:[%s741_s1 + $0x78] sm:$0xff]   ;;  %v543_v5 = vld [vmem:[%s741_s1 + $0x70] sm:$0xff]   ;;  %v547_v11 = vld [vmem:[%s741_s1 + $0x68] sm:$0xff]  }
   0x2   :  { %v540_v1 = vld [vmem:[%s741_s1 + $0xf8] sm:$0xff]   ;;  %523 = vmatprep.subr.msk.bf16.mxu0 %vm263_vm0, %v539_v0  ;;  %v544_v7 = vld [vmem:[%s741_s1 + $0xf0] sm:$0xff]   ;;  %v548_v13 = vld [vmem:[%s741_s1 + $0xe8] sm:$0xff]   ;;  %v84_v51 = vshrl.u32 %v83_v50, 7 }
   0x3   :  { %v541_v2 = vld [vmem:[%s741_s1 + $0x38] sm:$0xff]   ;;  %531 = vmatprep.subr.msk.bf16.mxu1 %vm263_vm0, %v540_v1  ;;  %v545_v8 = vld [vmem:[%s741_s1 + $0x30] sm:$0xff]   ;;  %v549_v14 = vld [vmem:[%s741_s1 + $0x28] sm:$0xff]  }
   0x4   :  { %v542_v3 = vld [vmem:[%s741_s1 + $0xb8] sm:$0xff]   ;;  %v289_v4 = vsel %vm263_vm0, %v541_v2, 0  ;;  %v546_v9 = vld [vmem:[%s741_s1 + $0xb0] sm:$0xff]   ;;  %v286_v10 = vsel %vm263_vm0, %v545_v8, 0  ;;  %v550_v15 = vld [vmem:[%s741_s1 + $0xa8] sm:$0xff]   ;;  %v283_v16 = vsel %vm263_vm0, %v549_v14, 0 }
   0x5   :  { %488 = vmatpush3.bf16.xpose.msra.mxu0 %v289_v4  ;;  %v337_v6 = vsel %vm263_vm0, %v542_v3, 0  ;;  %v334_v12 = vsel %vm263_vm0, %v546_v9, 0  ;;  %v551_v17 = vld [vmem:[%s741_s1 + $0x60] sm:$0xff]   ;;  %v331_v18 = vsel %vm263_vm0, %v550_v15, 0  ;;  %v555_v23 = vld [vmem:[%s741_s1 + $0x58] sm:$0xff]   ;;  %v559_v31 = vld [vmem:[%s741_s1 + $0x50] sm:$0xff]  }
   0x6   :  { %506 = vmatpush3.bf16.xpose.msra.mxu1 %v337_v6  ;;  %524 = vmatprep.subr.msk.bf16.mxu0 %vm263_vm0, %v543_v5  ;;  %v552_v19 = vld [vmem:[%s741_s1 + $0xe0] sm:$0xff]   ;;  %v556_v25 = vld [vmem:[%s741_s1 + $0xd8] sm:$0xff]   ;;  %v560_v33 = vld [vmem:[%s741_s1 + $0xd0] sm:$0xff]   ;;  %v85_v52 = vsub.s32 0, %v84_v51  ;;  %v93_v54 = vsub.s32 2, %v84_v51  ;;  %v89_v55 = vsub.s32 1, %v84_v51 }
   0x7   :  { %532 = vmatprep.subr.msk.bf16.mxu1 %vm263_vm0, %v544_v7  ;;  %v553_v20 = vld [vmem:[%s741_s1 + $0x20] sm:$0xff]   ;;  %v557_v26 = vld [vmem:[%s741_s1 + $0x18] sm:$0xff]   ;;  %v561_v34 = vld [vmem:[%s741_s1 + $0x10] sm:$0xff]   ;;  %v97_v56 = vsub.s32 3, %v84_v51 }
   0x8   :  { %v554_v21 = vld [vmem:[%s741_s1 + $0xa0] sm:$0xff]   ;;  %v280_v22 = vsel %vm263_vm0, %v553_v20, 0  ;;  %v558_v27 = vld [vmem:[%s741_s1 + $0x98] sm:$0xff]   ;;  %v277_v30 = vsel %vm263_vm0, %v557_v26, 0  ;;  %v562_v35 = vld [vmem:[%s741_s1 + $0x90] sm:$0xff]   ;;  %v274_v36 = vsel %vm263_vm0, %v561_v34, 0 }
   0x9   :  { %v328_v24 = vsel %vm263_vm0, %v554_v21, 0  ;;  %v15_v28 = vld [vmem:[%s742_s0] sm:$0xff]  ;;  %v325_v32 = vsel %vm263_vm0, %v558_v27, 0  ;;  %v563_v37 = vld [vmem:[%s741_s1 + $0x48] sm:$0xff]   ;;  %v322_v38 = vsel %vm263_vm0, %v562_v35, 0 }
   0xa   :  { %v16_v29 = vpack.c.bf16 %v15_v28, %v15_v28  ;;  %v564_v39 = vld [vmem:[%s741_s1 + $0xc8] sm:$0xff]   ;;  %v567_v43 = vld [vmem:[%s741_s1 + $0x40] sm:$0xff]  }
   0xb   :  { %v565_v40 = vld [vmem:[%s741_s1 + $0x8] sm:$0xff]   ;;  %v568_v45 = vld [vmem:[%s741_s1 + $0xc0] sm:$0xff]  }
   0xc   :  { %503 = vmatprep.mubr.msk.bf16.mxu0 %vm263_vm0, %v16_v29  ;;  %521 = vmatprep.mubr.msk.bf16.mxu1 %vm263_vm0, %v16_v29  ;;  %v566_v41 = vld [vmem:[%s741_s1 + $0x88] sm:$0xff]   ;;  %v271_v42 = vsel %vm263_vm0, %v565_v40, 0  ;;  %v569_v46 = vld [vmem:[%s741_s1] sm:$0xff]  }
   0xd   :  { %490 = vmatpush3.bf16.xpose.msra.mxu0 %v286_v10  ;;  %v319_v44 = vsel %vm263_vm0, %v566_v41, 0  ;;  %v570_v47 = vld [vmem:[%s741_s1 + $0x80] sm:$0xff]   ;;  %v268_v48 = vsel %vm263_vm0, %v569_v46, 0 }
   0xe   :  { %508 = vmatpush3.bf16.xpose.msra.mxu1 %v334_v12  ;;  %525 = vmatprep.subr.msk.bf16.mxu0 %vm263_vm0, %v547_v11  ;;  %v316_v49 = vsel %vm263_vm0, %v570_v47, 0  ;;  %v81_v53 = vld [vmem:[%s743_s2] sm:$0xf] }
   0xf   :  { %533 = vmatprep.subr.msk.bf16.mxu1 %vm263_vm0, %v548_v13  ;;  %v86_v57 = vrot.slane %v81_v53, %v85_v52  ;;  %v94_v58 = vrot.slane %v81_v53, %v93_v54  ;;  %v90_v59 = vrot.slane %v81_v53, %v89_v55  ;;  %v98_v61 = vrot.slane %v81_v53, %v97_v56 }
  0x15   :  { %492 = vmatpush3.bf16.xpose.msra.mxu0 %v283_v16 }
  0x16   :  { %510 = vmatpush3.bf16.xpose.msra.mxu1 %v331_v18  ;;  %526 = vmatprep.subr.msk.bf16.mxu0 %vm263_vm0, %v551_v17 }
  0x17   :  { %534 = vmatprep.subr.msk.bf16.mxu1 %vm263_vm0, %v552_v19 }
  0x1d   :  { %494 = vmatpush3.bf16.xpose.msra.mxu0 %v280_v22 }
  0x1e   :  { %512 = vmatpush3.bf16.xpose.msra.mxu1 %v328_v24  ;;  %527 = vmatprep.subr.msk.bf16.mxu0 %vm263_vm0, %v555_v23 }
  0x1f   :  { %535 = vmatprep.subr.msk.bf16.mxu1 %vm263_vm0, %v556_v25 }
  0x25   :  { %496 = vmatpush3.bf16.xpose.msra.mxu0 %v277_v30 }
  0x26   :  { %514 = vmatpush3.bf16.xpose.msra.mxu1 %v325_v32  ;;  %528 = vmatprep.subr.msk.bf16.mxu0 %vm263_vm0, %v559_v31 }
  0x27   :  { %536 = vmatprep.subr.msk.bf16.mxu1 %vm263_vm0, %v560_v33 }
  0x2d   :  { %498 = vmatpush3.bf16.xpose.msra.mxu0 %v274_v36 }
  0x2e   :  { %516 = vmatpush3.bf16.xpose.msra.mxu1 %v322_v38  ;;  %529 = vmatprep.subr.msk.bf16.mxu0 %vm263_vm0, %v563_v37 }
  0x2f   :  { %537 = vmatprep.subr.msk.bf16.mxu1 %vm263_vm0, %v564_v39 }
  0x35   :  { %500 = vmatpush3.bf16.xpose.msra.mxu0 %v271_v42 }
  0x36   :  { %518 = vmatpush3.bf16.xpose.msra.mxu1 %v319_v44  ;;  %530 = vmatprep.subr.msk.bf16.mxu0 %vm263_vm0, %v567_v43 }
  0x37   :  { %538 = vmatprep.subr.msk.bf16.mxu1 %vm263_vm0, %v568_v45 }
  0x3d   :  { %502 = vmatpush3.bf16.xpose.msra.mxu0 %v268_v48 }
  0x3e   :  { %520 = vmatpush3.bf16.xpose.msra.mxu1 %v316_v49 }
  0x44   :  { %504 = vmatmul.mubr.msk.bf16.vlgmr.msra.gmra.mxu0 %vm263_vm0, %v16_v29 }
  0x45   :  { %522 = vmatmul.mubr.msk.bf16.vlgmr.msra.gmra.mxu1 %vm263_vm0, %v16_v29 }
 0x104   :  { %v397_v60 = vpop.f32.mrf.mxu0 }
 0x105   :  { %v398_v62 = vadd.f32 %v397_v60, %v86_v57  ;;  %v438_v63 = vpop.f32.mrf.mxu1 }
 0x106   :  { %v439_v0 = vadd.f32 %v438_v63, %v94_v58  ;;  %v399_v1 = vpop.f32.mrf.mxu0 }
 0x107   :  { %445 = vst [vmem:[%s744_s3] sm:$0xff] %v398_v62  ;;  %v400_v2 = vadd.f32 %v399_v1, %v90_v59  ;;  %v440_v3 = vpop.f32.mrf.mxu1 }
 0x108   :  { %447 = vst [vmem:[%s744_s3 + $0x10] sm:$0xff] %v439_v0  ;;  %v441_v4 = vadd.f32 %v440_v3, %v98_v61  ;;  %v401_v5 = vpop.f32.mrf.mxu0 }
 0x109   :  { %446 = vst [vmem:[%s744_s3 + $0x8] sm:$0xff] %v400_v2  ;;  %v442_v6 = vpop.f32.mrf.mxu1 }
 0x10a   :  { %448 = vst [vmem:[%s744_s3 + $0x18] sm:$0xff] %v441_v4  ;;  %v402_v7 = vpop.f32.mrf.mxu0 }
 0x10b   :  { %v443_v8 = vpop.f32.mrf.mxu1 }

</bundles_post_ra>
